<compile_context>
chip_gen: v7x
topology: tpu7x:2x2x1
jax: 0.10.0
libtpu: 0.0.40
codegen_flags: <defaults>
</compile_context>

<pallas_src>
import functools

import jax
import jax.numpy as jnp
from jax import lax
from jax.experimental import pallas as pl
from jax.experimental.pallas import tpu as pltpu

OUT_PAD = 128    # lane-padded class axis (real C = 3); keep at 128 for v5e
VOCAB_PAD = 128  # lane-padded vocab axis (counts K-dim / fused-weight rows)
SEQ_PAD = 128    # lane-padded sequence axis for ids (sentinel -1 = "no token")


def _torchmodel_kernel(ids_ref, fw_ref, b_ref, out_ref, *, inv_len):
    # ids_ref : (bt, SEQ_PAD)        int32  token ids, padded slots == -1
    # fw_ref  : (VOCAB_PAD, OUT_PAD) f32    emb @ W.T, zero-padded rows/cols
    # b_ref   : (1, OUT_PAD)         f32    bias, zero-padded lanes
    # out_ref : (bt, OUT_PAD)        f32    sigmoid probs in lanes [0, 3)
    ids = ids_ref[...]
    bt, lp = ids.shape
    vp = fw_ref.shape[0]

    # Fused Embedding + AvgPool1d + Linear:
    #   mean_l emb[ids[b,l]] @ W.T  ==  counts[b,:] @ (emb @ W.T)
    # counts[b, v] = #{l : ids[b,l] == v} / L.  Sentinel -1 and padded batch
    # rows never match the iota; out-of-range ids hit zero-padded weight rows.
    vocab_iota = lax.broadcasted_iota(jnp.int32, (bt, lp, vp), 2)   # V on lanes
    hits = (vocab_iota == ids[:, :, None]).astype(jnp.float32)      # (bt,lp,vp)
    counts = jnp.sum(hits, axis=1) * jnp.float32(inv_len)           # (bt, vp)

    logits = jnp.dot(counts, fw_ref[...],
                     preferred_element_type=jnp.float32) + b_ref[...]
    out_ref[...] = jax.nn.sigmoid(logits)                           # (bt, OUT_PAD)


def make_torchmodel(emb_table, linear_w, linear_b, sentence_length):
    """Bind weights once (fusion + padding done here, NOT per call).

    Returns (forward, loss_fn):
      forward(ids)     -> (B, 3) sigmoid probabilities
      loss_fn(ids, y)  -> scalar CE loss (applied to probabilities, like the
                          original module)
    """
    V, D = emb_table.shape
    C = linear_w.shape[0]
    assert V <= VOCAB_PAD and C <= OUT_PAD and sentence_length <= SEQ_PAD
    # TODO(synk): for realistic vocab sizes, tile VOCAB as an "arbitrary" grid
    # axis with a VMEM accumulator (budget tiles for v7x's 64 MiB VMEM).

    # --- one-time weight preprocessing (outside the per-call jit path) -------
    fused = jnp.asarray(emb_table, jnp.float32) @ jnp.asarray(linear_w, jnp.float32).T
    fw_pad = jnp.zeros((VOCAB_PAD, OUT_PAD), jnp.float32).at[:V, :C].set(fused)
    b_pad = jnp.zeros((1, OUT_PAD), jnp.float32).at[:, :C].set(
        jnp.asarray(linear_b, jnp.float32).reshape(1, C))
    fw_pad = jax.device_put(fw_pad)
    b_pad = jax.device_put(b_pad)

    kernel = functools.partial(_torchmodel_kernel,
                               inv_len=1.0 / float(sentence_length))

    def _pcall(batch_pad, batch_tile):
        return pl.pallas_call(
            kernel,
            out_shape=jax.ShapeDtypeStruct((batch_pad, OUT_PAD), jnp.float32),
            grid=(batch_pad // batch_tile,),
            in_specs=[
                pl.BlockSpec((batch_tile, SEQ_PAD), lambda i: (i, 0)),
                pl.BlockSpec((VOCAB_PAD, OUT_PAD), lambda i: (0, 0)),
                pl.BlockSpec((1, OUT_PAD), lambda i: (0, 0)),
            ],
            out_specs=pl.BlockSpec((batch_tile, OUT_PAD), lambda i: (i, 0)),
            compiler_params=pltpu.CompilerParams(
                dimension_semantics=("parallel",)),  # 2 TCs on v7x when B grows
        )

    @jax.jit
    def forward(ids):
        B, L = ids.shape
        # Sublane-pad batch to a multiple of 8; one program per <=128-row tile.
        if B <= 128:
            bp = max(8, -(-B // 8) * 8)
            bt = bp
        else:
            bp = -(-B // 128) * 128
            bt = 128
        # Lane-pad ids to SEQ_PAD with sentinel -1 (never matches any vocab id).
        ids_pad = jnp.full((bp, SEQ_PAD), -1, dtype=jnp.int32)
        ids_pad = ids_pad.at[:B, :L].set(ids.astype(jnp.int32))
        out = _pcall(bp, bt)(ids_pad, fw_pad, b_pad)
        return out[:B, :C]

    @jax.jit
    def loss_fn(ids, y):
        # Mirrors the original module: CrossEntropyLoss (log_softmax + NLL,
        # mean over batch) applied to sigmoid *probabilities*. Plain-JAX glue
        # fused into the same jit as the kernel call.
        y_pred = forward(ids)
        logp = jax.nn.log_softmax(y_pred, axis=-1)
        nll = -jnp.take_along_axis(logp, y[:, None], axis=-1)[:, 0]
        return jnp.mean(nll)

    return forward, loss_fn


if __name__ == "__main__":
    # Shapes consistent with the module: vocab=30, vector_dim=32,
    # sentence_length=8, batch=2, 3 classes.
    V, D, L, B = 30, 32, 8, 2
    key = jax.random.PRNGKey(0)
    k_emb, k_w, k_b, k_ids, k_y = jax.random.split(key, 5)

    emb_table = jax.random.normal(k_emb, (V, D), dtype=jnp.float32)
    linear_w = jax.random.normal(k_w, (3, D), dtype=jnp.float32) * 0.1
    linear_b = jax.random.normal(k_b, (3,), dtype=jnp.float32) * 0.1
    ids = jax.random.randint(k_ids, (B, L), 0, V, dtype=jnp.int32)
    y = jax.random.randint(k_y, (B,), 0, 3, dtype=jnp.int32)

    forward, loss_fn = make_torchmodel(emb_table, linear_w, linear_b, L)

    # Inference path (y=None): sigmoid probabilities, shape (B, 3).
    y_pred = jax.block_until_ready(forward(ids))
    # Training path (y given): scalar CE loss on the probabilities.
    loss = jax.block_until_ready(loss_fn(ids, y))

    # Sanity check against a plain-JAX reference of the same math.
    ref = jax.nn.sigmoid(emb_table[ids].mean(axis=1) @ linear_w.T + linear_b)
    assert y_pred.shape == (B, 3) and loss.shape == ()
    assert jnp.allclose(y_pred, ref, atol=1e-5), (y_pred, ref)

    print("KERNEL_OK")
</pallas_src>

<mosaic_0001>
module attributes {stable_mosaic.version = 11 : i64} {
  func.func @_torchmodel_kernel(%arg0: i32, %arg1: memref<8x128xi32, #tpu.memory_space<vmem>>, %arg2: memref<128x128xf32, #tpu.memory_space<vmem>>, %arg3: memref<1x128xf32, #tpu.memory_space<vmem>>, %arg4: memref<8x128xf32, #tpu.memory_space<vmem>>) attributes {dimension_semantics = [#tpu.dimension_semantics<parallel>], iteration_bounds = array<i64: 1>, scalar_prefetch = 0 : i64, scratch_operands = 0 : i64, tpu.core_type = #tpu.core_type<tc>, window_params = [{transform_indices = @transform_0, window_bounds = array<i64: 8, 128>}, {pipeline_mode = #tpu.pipeline_mode<synchronous>, transform_indices = @transform_1, window_bounds = array<i64: 128, 128>}, {pipeline_mode = #tpu.pipeline_mode<synchronous>, transform_indices = @transform_2, window_bounds = array<i64: 1, 128>}, {transform_indices = @transform_3, window_bounds = array<i64: 8, 128>}]} {
    %c0 = arith.constant 0 : index
    %c0_0 = arith.constant 0 : index
    %0 = vector.load %arg1[%c0, %c0_0] : memref<8x128xi32, #tpu.memory_space<vmem>>, vector<8x128xi32>
    %1 = tpu.iota {dimensions = array<i32: 2>} : vector<8x128x128xi32>
    %2 = vector.shape_cast %0 : vector<8x128xi32> to vector<8x128x1xi32>
    %3 = vector.broadcast %2 : vector<8x128x1xi32> to vector<8x128x128xi32>
    %4 = arith.cmpi eq, %1, %3 : vector<8x128x128xi32>
    %5 = arith.extui %4 : vector<8x128x128xi1> to vector<8x128x128xi32>
    %6 = arith.sitofp %5 : vector<8x128x128xi32> to vector<8x128x128xf32>
    %cst = arith.constant dense<0.000000e+00> : vector<8x128xf32>
    %7 = vector.multi_reduction <add>, %6, %cst [1] : vector<8x128x128xf32> to vector<8x128xf32>
    %cst_1 = arith.constant 1.250000e-01 : f32
    %8 = vector.broadcast %cst_1 : f32 to vector<8x128xf32>
    %9 = arith.mulf %7, %8 : vector<8x128xf32>
    %c0_2 = arith.constant 0 : index
    %c0_3 = arith.constant 0 : index
    %10 = vector.load %arg2[%c0_2, %c0_3] : memref<128x128xf32, #tpu.memory_space<vmem>>, vector<128x128xf32>
    %cst_4 = arith.constant dense<0.000000e+00> : vector<8x128xf32>
    %11 = tpu.matmul %9, %10, %cst_4 {dimension_numbers = #tpu.dot_dimension_numbers<[1], [0], [0], [1], [0, 0, 1, 1], [], []>} : vector<8x128xf32>, vector<128x128xf32>, vector<8x128xf32> -> vector<8x128xf32>
    %c0_5 = arith.constant 0 : index
    %c0_6 = arith.constant 0 : index
    %12 = vector.load %arg3[%c0_5, %c0_6] : memref<1x128xf32, #tpu.memory_space<vmem>>, vector<1x128xf32>
    %13 = vector.broadcast %12 : vector<1x128xf32> to vector<8x128xf32>
    %14 = arith.addf %11, %13 : vector<8x128xf32>
    %15 = arith.negf %14 : vector<8x128xf32>
    %16 = math.exp %15 : vector<8x128xf32>
    %cst_7 = arith.constant 1.000000e+00 : f32
    %17 = vector.broadcast %cst_7 : f32 to vector<8x128xf32>
    %18 = arith.addf %17, %16 : vector<8x128xf32>
    %19 = arith.divf %17, %18 : vector<8x128xf32>
    %c0_8 = arith.constant 0 : index
    %c0_9 = arith.constant 0 : index
    %20 = vector.load %arg4[%c0_8, %c0_9] : memref<8x128xf32, #tpu.memory_space<vmem>>, vector<8x128xf32>
    tpu.vector_store %arg4[%c0_8, %c0_9], %19 {strides = array<i32>} : memref<8x128xf32, #tpu.memory_space<vmem>>, vector<8x128xf32>,
    return
  }
  func.func @transform_0(%arg0: i32) -> (i32, i32) {
    %c0_i32 = arith.constant 0 : i32
    %c0_i32_0 = arith.constant 0 : i32
    return %arg0, %c0_i32 : i32, i32
  }
  func.func @transform_1(%arg0: i32) -> (i32, i32) {
    %c0_i32 = arith.constant 0 : i32
    %c0_i32_0 = arith.constant 0 : i32
    %c0_i32_1 = arith.constant 0 : i32
    return %c0_i32, %c0_i32_0 : i32, i32
  }
  func.func @transform_2(%arg0: i32) -> (i32, i32) {
    %c0_i32 = arith.constant 0 : i32
    %c0_i32_0 = arith.constant 0 : i32
    %c0_i32_1 = arith.constant 0 : i32
    return %c0_i32, %c0_i32_0 : i32, i32
  }
  func.func @transform_3(%arg0: i32) -> (i32, i32) {
    %c0_i32 = arith.constant 0 : i32
    %c0_i32_0 = arith.constant 0 : i32
    return %arg0, %c0_i32 : i32, i32
  }
}

</mosaic_0001>

<bundles_post_ra>
// kernel: forward.1
= control target key start
LH: loop header
LB: loop body
LE: loop exit
PB: predicated region body
PF: predicated region fallthrough
CT: control target
= control target key end

     0   :  { %8 = vsyncpa [#allocation3], 0  ;;  %s1495_s12 = smov [#allocation2]   ;;  %s2031_s0 = inlined_call_operand.vmem [shape: s32[8,128], index: 0, kind: input, shape index: {}]   ;;  %s2032_s1 = inlined_call_operand.hbm [shape: f32[128,128], index: 1, kind: input, shape index: {}]   ;;  %s2033_s2 = inlined_call_operand.vmem [shape: f32[1,128], index: 2, kind: input, shape index: {}]   ;;  %s2034_s3 = inlined_call_operand.vmem [shape: f32[8,128], index: 3, kind: output, shape index: {}]  }
   0x1   :  { %s16_s13 = sshll.u32 %s1495_s12, 4  ;;  %s1471_s16 = scalar_lea.hbm %s2032_s1, 2048  ;;  %s17_s13 = int_to_ptr.vmem [resolvable:$true] %s16_s13 }
   0x2   :  { %p1472_p0 = scmp.ne.s32.totalorder %s2032_s1, %s1471_s16  ;;  %p1475_p1 = scmp.lt.u32.totalorder %s1471_s16, %s2032_s1 }
   0x4   :  { %p1477_p2 = pnand %p1475_p1, %p1472_p0 }
   0x6   :  { %1480 = shalt.err (!%p1477_p2)
}
   0x7   :  { %s1481_s21 = scalar_lea.vmem %s17_s13, 2048  ;;  %p1486_p4 = scmp.lt.s32.totalorder %s17_s13, %s17_s13 }
   0x8   :  { %p1482_p3 = scmp.ne.s32.totalorder %s17_s13, %s1481_s21  ;;  %p1487_p5 = scmp.lt.s32.totalorder %s1481_s21, %s1481_s21 }
   0xa   :  { %p1488_p6 = por %p1487_p5, %p1486_p4 }
   0xc   :  { %p1489_p7 = pnand %p1488_p6, %p1482_p3 }
   0xe   :  { %1492 = shalt.err (!%p1489_p7)
}
   0xf   :  { %s1496_s22 = smov 128   ;;  %s1497_s23 = smov 8  }
  0x10   :  { %22 = dma.hbm_to_vmem [thread:$0]  %s2032_s1, 2048, %s17_s13, [#allocation3], %s1496_s22, %s1496_s22, %s1497_s23  }
  0x11   :  { %1493 = dma.done.wait [#allocation3], 2048  }
  0x12   :  { %1494 = vsyncadd [#allocation3], 4294965248  ;;  %v29_v0 = vlaneseq  ;;  %v28_v4 = vld [vmem:[%s2031_s0] sm:$0xff]  ;;  %v1498_v44 = vmov 0.0  }
  0x14   :  { %v32_v1 = vshrl.u32 %v29_v0, 7  ;;  %v1658_v41 = vand.u32 127, %v29_v0 }
  0x16   :  { %v100_v2 = vsub.s32 1, %v32_v1  ;;  %v33_v3 = vsub.s32 0, %v32_v1  ;;  %v167_v7 = vsub.s32 2, %v32_v1  ;;  %v234_v9 = vsub.s32 3, %v32_v1 }
  0x17   :  { %v301_v11 = vsub.s32 4, %v32_v1  ;;  %v368_v13 = vsub.s32 5, %v32_v1  ;;  %v435_v15 = vsub.s32 6, %v32_v1  ;;  %v502_v17 = vsub.s32 7, %v32_v1 }
  0x18   :  { %v1537_v5 = vrot.slane %v28_v4, %v100_v2  ;;  %v1539_v6 = vrot.slane %v28_v4, %v33_v3  ;;  %v1545_v8 = vrot.slane %v28_v4, %v167_v7  ;;  %v1551_v10 = vrot.slane %v28_v4, %v234_v9 }
  0x19   :  { %v1555_v12 = vrot.slane %v28_v4, %v301_v11  ;;  %v1563_v14 = vrot.slane %v28_v4, %v368_v13  ;;  %v1569_v16 = vrot.slane %v28_v4, %v435_v15  ;;  %v1577_v18 = vrot.slane %v28_v4, %v502_v17 }
  0x1a   :  { %103 = vbcast.lane.b32.xlu1 %v1537_v5, 256  ;;  %36 = vbcast.lane.b32.xlu0 %v1539_v6, 256 }
  0x1e   :  { %107 = vbcast.lane.b32.xlu1 %v1537_v5, 264  ;;  %40 = vbcast.lane.b32.xlu0 %v1539_v6, 264 }
  0x22   :  { %174 = vbcast.lane.b32.xlu1 %v1545_v8, 264  ;;  %170 = vbcast.lane.b32.xlu0 %v1545_v8, 256 }
  0x26   :  { %111 = vbcast.lane.b32.xlu1 %v1537_v5, 272  ;;  %44 = vbcast.lane.b32.xlu0 %v1539_v6, 272 }
  0x2a   :  { %241 = vbcast.lane.b32.xlu1 %v1551_v10, 264  ;;  %237 = vbcast.lane.b32.xlu0 %v1551_v10, 256 }
  0x2e   :  { %304 = vbcast.lane.b32.xlu1 %v1555_v12, 256  ;;  %178 = vbcast.lane.b32.xlu0 %v1545_v8, 272 }
  0x32   :  { %48 = vbcast.lane.b32.xlu1 %v1539_v6, 280  ;;  %308 = vbcast.lane.b32.xlu0 %v1555_v12, 264 }
  0x36   :  { %245 = vbcast.lane.b32.xlu1 %v1551_v10, 272  ;;  %115 = vbcast.lane.b32.xlu0 %v1537_v5, 280 }
  0x3a   :  { %375 = vbcast.lane.b32.xlu1 %v1563_v14, 264  ;;  %371 = vbcast.lane.b32.xlu0 %v1563_v14, 256 }
  0x3e   :  { %312 = vbcast.lane.b32.xlu1 %v1555_v12, 272  ;;  %182 = vbcast.lane.b32.xlu0 %v1545_v8, 280 }
  0x42   :  { %442 = vbcast.lane.b32.xlu1 %v1569_v16, 264  ;;  %438 = vbcast.lane.b32.xlu0 %v1569_v16, 256 }
  0x46   :  { %119 = vbcast.lane.b32.xlu1 %v1537_v5, 288  ;;  %52 = vbcast.lane.b32.xlu0 %v1539_v6, 288 }
  0x4a   :  { %379 = vbcast.lane.b32.xlu1 %v1563_v14, 272  ;;  %249 = vbcast.lane.b32.xlu0 %v1551_v10, 280 }
  0x4e   :  { %509 = vbcast.lane.b32.xlu1 %v1577_v18, 264  ;;  %505 = vbcast.lane.b32.xlu0 %v1577_v18, 256 }
  0x52   :  { %316 = vbcast.lane.b32.xlu1 %v1555_v12, 280  ;;  %186 = vbcast.lane.b32.xlu0 %v1545_v8, 288 }
  0x56   :  { %56 = vbcast.lane.b32.xlu1 %v1539_v6, 296  ;;  %446 = vbcast.lane.b32.xlu0 %v1569_v16, 272 }
  0x5a   :  { %253 = vbcast.lane.b32.xlu1 %v1551_v10, 288  ;;  %123 = vbcast.lane.b32.xlu0 %v1537_v5, 296 }
  0x5e   :  { %513 = vbcast.lane.b32.xlu1 %v1577_v18, 272  ;;  %383 = vbcast.lane.b32.xlu0 %v1563_v14, 280 }
  0x62   :  { %320 = vbcast.lane.b32.xlu1 %v1555_v12, 288  ;;  %190 = vbcast.lane.b32.xlu0 %v1545_v8, 296 }
  0x66   :  { %60 = vbcast.lane.b32.xlu1 %v1539_v6, 304  ;;  %450 = vbcast.lane.b32.xlu0 %v1569_v16, 280 }
  0x6a   :  { %257 = vbcast.lane.b32.xlu1 %v1551_v10, 296  ;;  %127 = vbcast.lane.b32.xlu0 %v1537_v5, 304 }
  0x6e   :  { %517 = vbcast.lane.b32.xlu1 %v1577_v18, 280  ;;  %387 = vbcast.lane.b32.xlu0 %v1563_v14, 288 }
  0x72   :  { %324 = vbcast.lane.b32.xlu1 %v1555_v12, 296  ;;  %194 = vbcast.lane.b32.xlu0 %v1545_v8, 304 }
  0x76   :  { %64 = vbcast.lane.b32.xlu1 %v1539_v6, 312  ;;  %454 = vbcast.lane.b32.xlu0 %v1569_v16, 288 }
  0x7a   :  { %261 = vbcast.lane.b32.xlu1 %v1551_v10, 304  ;;  %131 = vbcast.lane.b32.xlu0 %v1537_v5, 312 }
  0x7e   :  { %521 = vbcast.lane.b32.xlu1 %v1577_v18, 288  ;;  %391 = vbcast.lane.b32.xlu0 %v1563_v14, 296 }
  0x82   :  { %328 = vbcast.lane.b32.xlu1 %v1555_v12, 304  ;;  %198 = vbcast.lane.b32.xlu0 %v1545_v8, 312 }
  0x86   :  { %68 = vbcast.lane.b32.xlu1 %v1539_v6, 320  ;;  %458 = vbcast.lane.b32.xlu0 %v1569_v16, 296 }
  0x8a   :  { %265 = vbcast.lane.b32.xlu1 %v1551_v10, 312  ;;  %135 = vbcast.lane.b32.xlu0 %v1537_v5, 320 }
  0x8c   :  { %v1611_v19 = vpop.permute.xlu1 %103  ;;  %v1613_v20 = vpop.permute.xlu0 %36 }
  0x8d   :  { %vm583_vm4 = vcmp.eq.s32.totalorder %v1658_v41, %v1611_v19  ;;  %vm567_vm6 = vcmp.eq.s32.totalorder %v1658_v41, %v1613_v20 }
  0x8e   :  { %525 = vbcast.lane.b32.xlu1 %v1577_v18, 296  ;;  %395 = vbcast.lane.b32.xlu0 %v1563_v14, 304  ;;  %v1271_v51 = vsel %vm583_vm4, 1.0, %v1498_v44  ;;  %v1255_v53 = vsel %vm567_vm6, 1.0, %v1498_v44 }
  0x90   :  { %v108_v21 = vpop.permute.xlu1 %107  ;;  %v41_v22 = vpop.permute.xlu0 %40 }
  0x91   :  { %vm584_vm0 = vcmp.eq.s32.totalorder %v1658_v41, %v108_v21  ;;  %vm568_vm1 = vcmp.eq.s32.totalorder %v1658_v41, %v41_v22 }
  0x92   :  { %332 = vbcast.lane.b32.xlu1 %v1555_v12, 312  ;;  %202 = vbcast.lane.b32.xlu0 %v1545_v8, 320  ;;  %v1272_v45 = vsel %vm584_vm0, 1.0, %v1498_v44  ;;  %v1256_v46 = vsel %vm568_vm1, 1.0, %v1498_v44 }
  0x93   :  { %v972_v54 = vadd.f32 %v1272_v45, %v1271_v51  ;;  %v951_v56 = vadd.f32 %v1256_v46, %v1255_v53 }
  0x94   :  { %v175_v23 = vpop.permute.xlu1 %174  ;;  %v171_v24 = vpop.permute.xlu0 %170 }
  0x95   :  { %vm600_vm2 = vcmp.eq.s32.totalorder %v1658_v41, %v175_v23  ;;  %vm599_vm3 = vcmp.eq.s32.totalorder %v1658_v41, %v171_v24 }
  0x96   :  { %72 = vbcast.lane.b32.xlu1 %v1539_v6, 328  ;;  %462 = vbcast.lane.b32.xlu0 %v1569_v16, 304  ;;  %v1288_v49 = vsel %vm600_vm2, 1.0, %v1498_v44  ;;  %v1287_v50 = vsel %vm599_vm3, 1.0, %v1498_v44 }
  0x97   :  { %v1690_v57 = vadd.f32 %v1288_v49, %v1287_v50 }
  0x98   :  { %v112_v25 = vpop.permute.xlu1 %111  ;;  %v45_v26 = vpop.permute.xlu0 %44 }
  0x99   :  { %vm585_vm5 = vcmp.eq.s32.totalorder %v1658_v41, %v112_v25  ;;  %vm569_vm7 = vcmp.eq.s32.totalorder %v1658_v41, %v45_v26 }
  0x9a   :  { %269 = vbcast.lane.b32.xlu1 %v1551_v10, 320  ;;  %139 = vbcast.lane.b32.xlu0 %v1537_v5, 328  ;;  %v1273_v52 = vsel %vm585_vm5, 1.0, %v1498_v44  ;;  %v1257_v55 = vsel %vm569_vm7, 1.0, %v1498_v44 }
  0x9b   :  { %v973_v62 = vadd.f32 %v1273_v52, %v972_v54  ;;  %v952_v63 = vadd.f32 %v1257_v55, %v951_v56 }
  0x9c   :  { %v242_v27 = vpop.permute.xlu1 %241  ;;  %v238_v28 = vpop.permute.xlu0 %237 }
  0x9d   :  { %vm616_vm8 = vcmp.eq.s32.totalorder %v1658_v41, %v242_v27  ;;  %vm615_vm9 = vcmp.eq.s32.totalorder %v1658_v41, %v238_v28 }
  0x9e   :  { %529 = vbcast.lane.b32.xlu1 %v1577_v18, 304  ;;  %399 = vbcast.lane.b32.xlu0 %v1563_v14, 312  ;;  %v1304_v58 = vsel %vm616_vm8, 1.0, %v1498_v44  ;;  %v1303_v59 = vsel %vm615_vm9, 1.0, %v1498_v44 }
  0x9f   :  { %v1014_v0 = vadd.f32 %v1304_v58, %v1303_v59 }
  0xa0   :  { %v1625_v29 = vpop.permute.xlu1 %304  ;;  %v1627_v30 = vpop.permute.xlu0 %178 }
  0xa1   :  { %vm631_vm15 = vcmp.eq.s32.totalorder %v1658_v41, %v1625_v29  ;;  %vm601_vm0 = vcmp.eq.s32.totalorder %v1658_v41, %v1627_v30 }
  0xa2   :  { %336 = vbcast.lane.b32.xlu1 %v1555_v12, 320  ;;  %206 = vbcast.lane.b32.xlu0 %v1545_v8, 328  ;;  %v1319_v13 = vsel %vm631_vm15, 1.0, %v1498_v44  ;;  %v1289_v15 = vsel %vm601_vm0, 1.0, %v1498_v44 }
  0xa3   :  { %v994_v51 = vadd.f32 %v1289_v15, %v1690_v57 }
  0xa4   :  { %v1631_v31 = vpop.permute.xlu1 %48  ;;  %v1633_v32 = vpop.permute.xlu0 %308 }
  0xa5   :  { %vm570_vm10 = vcmp.eq.s32.totalorder %v1658_v41, %v1631_v31  ;;  %vm632_vm2 = vcmp.eq.s32.totalorder %v1658_v41, %v1633_v32 }
  0xa6   :  { %76 = vbcast.lane.b32.xlu1 %v1539_v6, 336  ;;  %466 = vbcast.lane.b32.xlu0 %v1569_v16, 312  ;;  %v1258_v1 = vsel %vm570_vm10, 1.0, %v1498_v44  ;;  %v1320_v20 = vsel %vm632_vm2, 1.0, %v1498_v44 }
  0xa7   :  { %v953_v19 = vadd.f32 %v1258_v1, %v952_v63  ;;  %v1035_v52 = vadd.f32 %v1320_v20, %v1319_v13 }
  0xa8   :  { %v1637_v33 = vpop.permute.xlu1 %245  ;;  %v1639_v34 = vpop.permute.xlu0 %115 }
  0xa9   :  { %vm617_vm11 = vcmp.eq.s32.totalorder %v1658_v41, %v1637_v33  ;;  %vm586_vm12 = vcmp.eq.s32.totalorder %v1658_v41, %v1639_v34 }
  0xaa   :  { %273 = vbcast.lane.b32.xlu1 %v1551_v10, 328  ;;  %143 = vbcast.lane.b32.xlu0 %v1537_v5, 336  ;;  %v1305_v2 = vsel %vm617_vm11, 1.0, %v1498_v44  ;;  %v1274_v3 = vsel %vm586_vm12, 1.0, %v1498_v44 }
  0xab   :  { %v1015_v21 = vadd.f32 %v1305_v2, %v1014_v0  ;;  %v974_v22 = vadd.f32 %v1274_v3, %v973_v62 }
  0xac   :  { %v1643_v35 = vpop.permute.xlu1 %375  ;;  %v1645_v36 = vpop.permute.xlu0 %371 }
  0xad   :  { %vm648_vm3 = vcmp.eq.s32.totalorder %v1658_v41, %v1643_v35  ;;  %vm647_vm4 = vcmp.eq.s32.totalorder %v1658_v41, %v1645_v36 }
  0xae   :  { %533 = vbcast.lane.b32.xlu1 %v1577_v18, 312  ;;  %403 = vbcast.lane.b32.xlu0 %v1563_v14, 320  ;;  %v1336_v23 = vsel %vm648_vm3, 1.0, %v1498_v44  ;;  %v1335_v24 = vsel %vm647_vm4, 1.0, %v1498_v44 }
  0xaf   :  { %v1056_v35 = vadd.f32 %v1336_v23, %v1335_v24 }
  0xb0   :  { %v1649_v37 = vpop.permute.xlu1 %312  ;;  %v1651_v38 = vpop.permute.xlu0 %182 }
  0xb1   :  { %vm633_vm12 = vcmp.eq.s32.totalorder %v1658_v41, %v1649_v37 }
  0xb2   :  { %340 = vbcast.lane.b32.xlu1 %v1555_v12, 328  ;;  %210 = vbcast.lane.b32.xlu0 %v1545_v8, 336  ;;  %v1321_v53 = vsel %vm633_vm12, 1.0, %v1498_v44 }
  0xb4   :  { %v443_v39 = vpop.permute.xlu1 %442  ;;  %v439_v40 = vpop.permute.xlu0 %438 }
  0xb5   :  { %vm664_vm13 = vcmp.eq.s32.totalorder %v1658_v41, %v443_v39  ;;  %vm663_vm14 = vcmp.eq.s32.totalorder %v1658_v41, %v439_v40 }
  0xb6   :  { %80 = vbcast.lane.b32.xlu1 %v1539_v6, 344  ;;  %470 = vbcast.lane.b32.xlu0 %v1569_v16, 320  ;;  %v1352_v9 = vsel %vm664_vm13, 1.0, %v1498_v44  ;;  %v1351_v11 = vsel %vm663_vm14, 1.0, %v1498_v44  ;;  %vm602_vm13 = vcmp.eq.s32.totalorder %v1658_v41, %v1651_v38  ;;  %v1036_v38 = vadd.f32 %v1321_v53, %v1035_v52 }
  0xb7   :  { %v1077_v25 = vadd.f32 %v1352_v9, %v1351_v11  ;;  %v1290_v54 = vsel %vm602_vm13, 1.0, %v1498_v44 }
  0xb8   :  { %v1660_v42 = vpop.permute.xlu1 %119  ;;  %v53_v43 = vpop.permute.xlu0 %52  ;;  %v995_v62 = vadd.f32 %v1290_v54, %v994_v51 }
  0xb9   :  { %vm571_vm1 = vcmp.eq.s32.totalorder %v1658_v41, %v53_v43  ;;  %vm587_vm5 = vcmp.eq.s32.totalorder %v1658_v41, %v1660_v42 }
  0xba   :  { %277 = vbcast.lane.b32.xlu1 %v1551_v10, 336  ;;  %147 = vbcast.lane.b32.xlu0 %v1537_v5, 344  ;;  %v1259_v17 = vsel %vm571_vm1, 1.0, %v1498_v44  ;;  %v1275_v28 = vsel %vm587_vm5, 1.0, %v1498_v44 }
  0xbb   :  { %v954_v29 = vadd.f32 %v1259_v17, %v953_v19  ;;  %v975_v36 = vadd.f32 %v1275_v28, %v974_v22 }
  0xbc   :  { %v1676_v47 = vpop.permute.xlu1 %379  ;;  %v1678_v48 = vpop.permute.xlu0 %249 }
  0xbd   :  { %vm618_vm6 = vcmp.eq.s32.totalorder %v1658_v41, %v1678_v48  ;;  %vm649_vm9 = vcmp.eq.s32.totalorder %v1658_v41, %v1676_v47 }
  0xbe   :  { %537 = vbcast.lane.b32.xlu1 %v1577_v18, 320  ;;  %407 = vbcast.lane.b32.xlu0 %v1563_v14, 328  ;;  %v1306_v30 = vsel %vm618_vm6, 1.0, %v1498_v44  ;;  %v1337_v42 = vsel %vm649_vm9, 1.0, %v1498_v44 }
  0xbf   :  { %v1016_v43 = vadd.f32 %v1306_v30, %v1015_v21  ;;  %v1057_v58 = vadd.f32 %v1337_v42, %v1056_v35 }
  0xc0   :  { %v1694_v60 = vpop.permute.xlu1 %509  ;;  %v1696_v61 = vpop.permute.xlu0 %505 }
  0xc1   :  { %vm680_vm10 = vcmp.eq.s32.totalorder %v1658_v41, %v1694_v60  ;;  %vm679_vm11 = vcmp.eq.s32.totalorder %v1658_v41, %v1696_v61 }
  0xc2   :  { %344 = vbcast.lane.b32.xlu1 %v1555_v12, 336  ;;  %214 = vbcast.lane.b32.xlu0 %v1545_v8, 344  ;;  %v1368_v45 = vsel %vm680_vm10, 1.0, %v1498_v44  ;;  %v1367_v46 = vsel %vm679_vm11, 1.0, %v1498_v44 }
  0xc3   :  { %v1098_v59 = vadd.f32 %v1368_v45, %v1367_v46 }
  0xc4   :  { %v1718_v4 = vpop.permute.xlu1 %316  ;;  %v1720_v7 = vpop.permute.xlu0 %186 }
  0xc5   :  { %vm634_vm0 = vcmp.eq.s32.totalorder %v1658_v41, %v1718_v4  ;;  %vm603_vm1 = vcmp.eq.s32.totalorder %v1658_v41, %v1720_v7 }
  0xc6   :  { %84 = vbcast.lane.b32.xlu1 %v1539_v6, 352  ;;  %474 = vbcast.lane.b32.xlu0 %v1569_v16, 328  ;;  %v1322_v57 = vsel %vm634_vm0, 1.0, %v1498_v44  ;;  %v1291_v60 = vsel %vm603_vm1, 1.0, %v1498_v44 }
  0xc7   :  { %v1037_v3 = vadd.f32 %v1322_v57, %v1036_v38  ;;  %v996_v4 = vadd.f32 %v1291_v60, %v995_v62 }
  0xc8   :  { %v57_v26 = vpop.permute.xlu1 %56  ;;  %v447_v27 = vpop.permute.xlu0 %446 }
  0xc9   :  { %vm572_vm7 = vcmp.eq.s32.totalorder %v1658_v41, %v57_v26  ;;  %vm665_vm8 = vcmp.eq.s32.totalorder %v1658_v41, %v447_v27 }
  0xca   :  { %v1260_v31 = vsel %vm572_vm7, 1.0, %v1498_v44  ;;  %v1353_v32 = vsel %vm665_vm8, 1.0, %v1498_v44  ;;  %281 = vbcast.lane.b32.xlu1 %v1551_v10, 344  ;;  %151 = vbcast.lane.b32.xlu0 %v1537_v5, 352 }
  0xcb   :  { %v955_v33 = vadd.f32 %v1260_v31, %v954_v29  ;;  %v1078_v34 = vadd.f32 %v1353_v32, %v1077_v25 }
  0xcc   :  { %v254_v39 = vpop.permute.xlu1 %253  ;;  %v124_v40 = vpop.permute.xlu0 %123 }
  0xcd   :  { %vm619_vm14 = vcmp.eq.s32.totalorder %v1658_v41, %v254_v39  ;;  %vm588_vm15 = vcmp.eq.s32.totalorder %v1658_v41, %v124_v40 }
  0xce   :  { %v1307_v48 = vsel %vm619_vm14, 1.0, %v1498_v44  ;;  %v1276_v49 = vsel %vm588_vm15, 1.0, %v1498_v44  ;;  %541 = vbcast.lane.b32.xlu1 %v1577_v18, 328  ;;  %411 = vbcast.lane.b32.xlu0 %v1563_v14, 336 }
  0xcf   :  { %v1017_v47 = vadd.f32 %v1307_v48, %v1016_v43  ;;  %v976_v50 = vadd.f32 %v1276_v49, %v975_v36 }
  0xd0   :  { %v514_v55 = vpop.permute.xlu1 %513  ;;  %v384_v56 = vpop.permute.xlu0 %383 }
  0xd1   :  { %vm681_vm2 = vcmp.eq.s32.totalorder %v1658_v41, %v514_v55  ;;  %vm650_vm3 = vcmp.eq.s32.totalorder %v1658_v41, %v384_v56 }
  0xd2   :  { %v1369_v37 = vsel %vm681_vm2, 1.0, %v1498_v44  ;;  %v1338_v61 = vsel %vm650_vm3, 1.0, %v1498_v44  ;;  %348 = vbcast.lane.b32.xlu1 %v1555_v12, 344  ;;  %218 = vbcast.lane.b32.xlu0 %v1545_v8, 352 }
  0xd3   :  { %v1099_v63 = vadd.f32 %v1369_v37, %v1098_v59  ;;  %v1058_v0 = vadd.f32 %v1338_v61, %v1057_v58 }
  0xd4   :  { %v321_v1 = vpop.permute.xlu1 %320  ;;  %v191_v2 = vpop.permute.xlu0 %190 }
  0xd5   :  { %vm635_vm4 = vcmp.eq.s32.totalorder %v1658_v41, %v321_v1  ;;  %vm604_vm5 = vcmp.eq.s32.totalorder %v1658_v41, %v191_v2 }
  0xd6   :  { %v1323_v7 = vsel %vm635_vm4, 1.0, %v1498_v44  ;;  %v1292_v9 = vsel %vm604_vm5, 1.0, %v1498_v44  ;;  %88 = vbcast.lane.b32.xlu1 %v1539_v6, 360  ;;  %478 = vbcast.lane.b32.xlu0 %v1569_v16, 336 }
  0xd7   :  { %v1038_v11 = vadd.f32 %v1323_v7, %v1037_v3  ;;  %v997_v13 = vadd.f32 %v1292_v9, %v996_v4 }
  0xd8   :  { %v61_v15 = vpop.permute.xlu1 %60  ;;  %v451_v17 = vpop.permute.xlu0 %450 }
  0xd9   :  { %vm573_vm6 = vcmp.eq.s32.totalorder %v1658_v41, %v61_v15  ;;  %vm666_vm7 = vcmp.eq.s32.totalorder %v1658_v41, %v451_v17  ;;  %v1127_v17 = vld [vmem:[#allocation2] sm:$0xff] }
  0xda   :  { %v1261_v19 = vsel %vm573_vm6, 1.0, %v1498_v44  ;;  %v1354_v20 = vsel %vm666_vm7, 1.0, %v1498_v44  ;;  %285 = vbcast.lane.b32.xlu1 %v1551_v10, 352  ;;  %155 = vbcast.lane.b32.xlu0 %v1537_v5, 360 }
  0xdb   :  { %v956_v21 = vadd.f32 %v1261_v19, %v955_v33  ;;  %v1079_v22 = vadd.f32 %v1354_v20, %v1078_v34  ;;  %v1128_v19 = vld [vmem:[#allocation2 + $0x8] sm:$0xff] }
  0xdc   :  { %v258_v23 = vpop.permute.xlu1 %257  ;;  %v128_v24 = vpop.permute.xlu0 %127 }
  0xdd   :  { %vm620_vm8 = vcmp.eq.s32.totalorder %v1658_v41, %v258_v23  ;;  %vm589_vm9 = vcmp.eq.s32.totalorder %v1658_v41, %v128_v24  ;;  %v1499_v24 = vmov 0.0|0.0  }
  0xde   :  { %v1308_v25 = vsel %vm620_vm8, 1.0, %v1498_v44  ;;  %v1277_v26 = vsel %vm589_vm9, 1.0, %v1498_v44  ;;  %545 = vbcast.lane.b32.xlu1 %v1577_v18, 336  ;;  %415 = vbcast.lane.b32.xlu0 %v1563_v14, 344 }
  0xdf   :  { %v1018_v27 = vadd.f32 %v1308_v25, %v1017_v47  ;;  %v977_v28 = vadd.f32 %v1277_v26, %v976_v50  ;;  %1437 = vmatprep.subr.bf16.mxu0 %v1499_v24 }
  0xe0   :  { %v518_v29 = vpop.permute.xlu1 %517  ;;  %v388_v30 = vpop.permute.xlu0 %387 }
  0xe1   :  { %vm682_vm10 = vcmp.eq.s32.totalorder %v1658_v41, %v518_v29  ;;  %vm651_vm11 = vcmp.eq.s32.totalorder %v1658_v41, %v388_v30 }
  0xe2   :  { %v1370_v31 = vsel %vm682_vm10, 1.0, %v1498_v44  ;;  %v1339_v32 = vsel %vm651_vm11, 1.0, %v1498_v44  ;;  %352 = vbcast.lane.b32.xlu1 %v1555_v12, 352  ;;  %222 = vbcast.lane.b32.xlu0 %v1545_v8, 360 }
  0xe3   :  { %v1100_v33 = vadd.f32 %v1370_v31, %v1099_v63  ;;  %v1059_v34 = vadd.f32 %v1339_v32, %v1058_v0 }
  0xe4   :  { %v325_v35 = vpop.permute.xlu1 %324  ;;  %v195_v36 = vpop.permute.xlu0 %194 }
  0xe5   :  { %vm636_vm12 = vcmp.eq.s32.totalorder %v1658_v41, %v325_v35  ;;  %vm605_vm13 = vcmp.eq.s32.totalorder %v1658_v41, %v195_v36  ;;  %v1131_v36 = vld [vmem:[#allocation2 + $0x20] sm:$0xff] }
  0xe6   :  { %v1324_v39 = vsel %vm636_vm12, 1.0, %v1498_v44  ;;  %v1293_v40 = vsel %vm605_vm13, 1.0, %v1498_v44  ;;  %92 = vbcast.lane.b32.xlu1 %v1539_v6, 368  ;;  %482 = vbcast.lane.b32.xlu0 %v1569_v16, 344 }
  0xe7   :  { %v1039_v42 = vadd.f32 %v1324_v39, %v1038_v11  ;;  %v998_v43 = vadd.f32 %v1293_v40, %v997_v13  ;;  %v1132_v39 = vld [vmem:[#allocation2 + $0x28] sm:$0xff] }
  0xe8   :  { %v65_v45 = vpop.permute.xlu1 %64  ;;  %v455_v46 = vpop.permute.xlu0 %454 }
  0xe9   :  { %vm574_vm14 = vcmp.eq.s32.totalorder %v1658_v41, %v65_v45  ;;  %vm667_vm15 = vcmp.eq.s32.totalorder %v1658_v41, %v455_v46 }
  0xea   :  { %v1262_v48 = vsel %vm574_vm14, 1.0, %v1498_v44  ;;  %v1355_v49 = vsel %vm667_vm15, 1.0, %v1498_v44  ;;  %289 = vbcast.lane.b32.xlu1 %v1551_v10, 360  ;;  %159 = vbcast.lane.b32.xlu0 %v1537_v5, 368 }
  0xeb   :  { %v957_v47 = vadd.f32 %v1262_v48, %v956_v21  ;;  %v1080_v50 = vadd.f32 %v1355_v49, %v1079_v22  ;;  %v1438_v22 = vpack.c.bf16 %v1128_v19, %v1127_v17  ;;  %v1133_v49 = vld [vmem:[#allocation2 + $0x30] sm:$0xff] }
  0xec   :  { %v262_v51 = vpop.permute.xlu1 %261  ;;  %v132_v52 = vpop.permute.xlu0 %131 }
  0xed   :  { %vm621_vm0 = vcmp.eq.s32.totalorder %v1658_v41, %v262_v51  ;;  %vm590_vm1 = vcmp.eq.s32.totalorder %v1658_v41, %v132_v52  ;;  %1439 = vmatpush3.bf16.msra.mxu0 %v1438_v22 }
  0xee   :  { %v1309_v53 = vsel %vm621_vm0, 1.0, %v1498_v44  ;;  %v1278_v54 = vsel %vm590_vm1, 1.0, %v1498_v44  ;;  %549 = vbcast.lane.b32.xlu1 %v1577_v18, 344  ;;  %419 = vbcast.lane.b32.xlu0 %v1563_v14, 352 }
  0xef   :  { %v1019_v55 = vadd.f32 %v1309_v53, %v1018_v27  ;;  %v978_v56 = vadd.f32 %v1278_v54, %v977_v28  ;;  %1440 = vmatprep.subr.bf16.mxu0 %v1499_v24  ;;  %v1129_v27 = vld [vmem:[#allocation2 + $0x10] sm:$0xff]  ;;  %v1130_v28 = vld [vmem:[#allocation2 + $0x18] sm:$0xff] }
  0xf0   :  { %v522_v58 = vpop.permute.xlu1 %521  ;;  %v392_v59 = vpop.permute.xlu0 %391  ;;  %v1441_v31 = vpack.c.bf16 %v1130_v28, %v1129_v27 }
  0xf1   :  { %vm683_vm2 = vcmp.eq.s32.totalorder %v1658_v41, %v522_v58  ;;  %vm652_vm3 = vcmp.eq.s32.totalorder %v1658_v41, %v392_v59  ;;  %v1136_v58 = vld [vmem:[#allocation2 + $0x48] sm:$0xff] }
  0xf2   :  { %v1371_v57 = vsel %vm683_vm2, 1.0, %v1498_v44  ;;  %v1340_v60 = vsel %vm652_vm3, 1.0, %v1498_v44  ;;  %356 = vbcast.lane.b32.xlu1 %v1555_v12, 360  ;;  %226 = vbcast.lane.b32.xlu0 %v1545_v8, 368 }
  0xf3   :  { %v1101_v37 = vadd.f32 %v1371_v57, %v1100_v33  ;;  %v1060_v61 = vadd.f32 %v1340_v60, %v1059_v34  ;;  %1442 = vmatpush3.bf16.msra.mxu0 %v1441_v31 }
  0xf4   :  { %v329_v38 = vpop.permute.xlu1 %328  ;;  %v199_v62 = vpop.permute.xlu0 %198  ;;  %1443 = vmatprep.subr.bf16.mxu0 %v1499_v24 }
  0xf5   :  { %vm637_vm4 = vcmp.eq.s32.totalorder %v1658_v41, %v329_v38  ;;  %vm606_vm5 = vcmp.eq.s32.totalorder %v1658_v41, %v199_v62 }
  0xf6   :  { %v1325_v63 = vsel %vm637_vm4, 1.0, %v1498_v44  ;;  %v1294_v0 = vsel %vm606_vm5, 1.0, %v1498_v44  ;;  %96 = vbcast.lane.b32.xlu1 %v1539_v6, 376  ;;  %486 = vbcast.lane.b32.xlu0 %v1569_v16, 352 }
  0xf7   :  { %v1040_v1 = vadd.f32 %v1325_v63, %v1039_v42  ;;  %v999_v2 = vadd.f32 %v1294_v0, %v998_v43  ;;  %v1137_v63 = vld [vmem:[#allocation2 + $0x50] sm:$0xff]  ;;  %v1138_v0 = vld [vmem:[#allocation2 + $0x58] sm:$0xff] }
  0xf8   :  { %v69_v3 = vpop.permute.xlu1 %68  ;;  %v459_v4 = vpop.permute.xlu0 %458 }
  0xf9   :  { %vm575_vm6 = vcmp.eq.s32.totalorder %v1658_v41, %v69_v3  ;;  %vm668_vm7 = vcmp.eq.s32.totalorder %v1658_v41, %v459_v4 }
  0xfa   :  { %v1263_v7 = vsel %vm575_vm6, 1.0, %v1498_v44  ;;  %v1356_v9 = vsel %vm668_vm7, 1.0, %v1498_v44  ;;  %293 = vbcast.lane.b32.xlu1 %v1551_v10, 368  ;;  %163 = vbcast.lane.b32.xlu0 %v1537_v5, 376  ;;  %vm1500_vm6 = vmmov 0  }
  0xfb   :  { %v958_v11 = vadd.f32 %v1263_v7, %v957_v47  ;;  %v1081_v6 = vadd.f32 %v1356_v9, %v1080_v50  ;;  %v1134_v47 = vld [vmem:[#allocation2 + $0x38] sm:$0xff]  ;;  %1434 = vmatprep.mubr.msk.f32.mxu0 %vm1500_vm6, %v1498_v44 }
  0xfc   :  { %v266_v13 = vpop.permute.xlu1 %265  ;;  %v136_v15 = vpop.permute.xlu0 %135  ;;  %v1447_v51 = vpack.c.bf16 %v1134_v47, %v1133_v49 }
  0xfd   :  { %vm622_vm8 = vcmp.eq.s32.totalorder %v1658_v41, %v266_v13  ;;  %vm591_vm9 = vcmp.eq.s32.totalorder %v1658_v41, %v136_v15 }
  0xfe   :  { %v1310_v20 = vsel %vm622_vm8, 1.0, %v1498_v44  ;;  %v1279_v21 = vsel %vm591_vm9, 1.0, %v1498_v44  ;;  %553 = vbcast.lane.b32.xlu1 %v1577_v18, 352  ;;  %423 = vbcast.lane.b32.xlu0 %v1563_v14, 360 }
  0xff   :  { %v1020_v5 = vadd.f32 %v1310_v20, %v1019_v55  ;;  %v979_v23 = vadd.f32 %v1279_v21, %v978_v56  ;;  %v1135_v56 = vld [vmem:[#allocation2 + $0x40] sm:$0xff]  ;;  %v1141_v20 = vld [vmem:[#allocation2 + $0x70] sm:$0xff]  ;;  %v1142_v21 = vld [vmem:[#allocation2 + $0x78] sm:$0xff] }
 0x100   :  { %v526_v25 = vpop.permute.xlu1 %525  ;;  %v396_v26 = vpop.permute.xlu0 %395  ;;  %v1450_v60 = vpack.c.bf16 %v1136_v58, %v1135_v56 }
 0x101   :  { %vm684_vm10 = vcmp.eq.s32.totalorder %v1658_v41, %v526_v25  ;;  %vm653_vm11 = vcmp.eq.s32.totalorder %v1658_v41, %v396_v26 }
 0x102   :  { %v1372_v29 = vsel %vm684_vm10, 1.0, %v1498_v44  ;;  %v1341_v30 = vsel %vm653_vm11, 1.0, %v1498_v44  ;;  %360 = vbcast.lane.b32.xlu1 %v1555_v12, 368  ;;  %230 = vbcast.lane.b32.xlu0 %v1545_v8, 376  ;;  %v1444_v8 = vpack.c.bf16 %v1132_v39, %v1131_v36 }
 0x103   :  { %v1102_v32 = vadd.f32 %v1372_v29, %v1101_v37  ;;  %v1061_v33 = vadd.f32 %v1341_v30, %v1060_v61 }
 0x104   :  { %v333_v34 = vpop.permute.xlu1 %332  ;;  %v203_v35 = vpop.permute.xlu0 %202  ;;  %1445 = vmatpush3.bf16.msra.mxu0 %v1444_v8 }
 0x105   :  { %vm638_vm12 = vcmp.eq.s32.totalorder %v1658_v41, %v333_v34  ;;  %vm607_vm13 = vcmp.eq.s32.totalorder %v1658_v41, %v203_v35  ;;  %1446 = vmatprep.subr.bf16.mxu0 %v1499_v24 }
 0x106   :  { %v1326_v40 = vsel %vm638_vm12, 1.0, %v1498_v44  ;;  %v1295_v42 = vsel %vm607_vm13, 1.0, %v1498_v44  ;;  %297 = vbcast.lane.b32.xlu1 %v1551_v10, 376  ;;  %490 = vbcast.lane.b32.xlu0 %v1569_v16, 360 }
 0x107   :  { %v1041_v43 = vadd.f32 %v1326_v40, %v1040_v1  ;;  %v1000_v45 = vadd.f32 %v1295_v42, %v999_v2 }
 0x108   :  { %v73_v46 = vpop.permute.xlu1 %72  ;;  %v463_v48 = vpop.permute.xlu0 %462  ;;  %1448 = vmatpush3.bf16.msra.mxu0 %v1447_v51 }
 0x109   :  { %vm576_vm14 = vcmp.eq.s32.totalorder %v1658_v41, %v73_v46  ;;  %vm669_vm15 = vcmp.eq.s32.totalorder %v1658_v41, %v463_v48  ;;  %1449 = vmatprep.subr.bf16.mxu0 %v1499_v24 }
 0x10a   :  { %v1264_v50 = vsel %vm576_vm14, 1.0, %v1498_v44  ;;  %v1357_v10 = vsel %vm669_vm15, 1.0, %v1498_v44  ;;  %557 = vbcast.lane.b32.xlu1 %v1577_v18, 360  ;;  %427 = vbcast.lane.b32.xlu0 %v1563_v14, 368 }
 0x10b   :  { %v959_v52 = vadd.f32 %v1264_v50, %v958_v11  ;;  %v1082_v53 = vadd.f32 %v1357_v10, %v1081_v6  ;;  %v1139_v11 = vld [vmem:[#allocation2 + $0x60] sm:$0xff]  ;;  %v1140_v6 = vld [vmem:[#allocation2 + $0x68] sm:$0xff] }
 0x10c   :  { %v270_v54 = vpop.permute.xlu1 %269  ;;  %v140_v55 = vpop.permute.xlu0 %139  ;;  %1451 = vmatpush3.bf16.msra.mxu0 %v1450_v60 }
 0x10d   :  { %vm623_vm0 = vcmp.eq.s32.totalorder %v1658_v41, %v270_v54  ;;  %vm592_vm1 = vcmp.eq.s32.totalorder %v1658_v41, %v140_v55  ;;  %1452 = vmatprep.subr.bf16.mxu0 %v1499_v24 }
 0x10e   :  { %v1311_v59 = vsel %vm623_vm0, 1.0, %v1498_v44  ;;  %v1280_v57 = vsel %vm592_vm1, 1.0, %v1498_v44  ;;  %494 = vbcast.lane.b32.xlu1 %v1569_v16, 368  ;;  %364 = vbcast.lane.b32.xlu0 %v1555_v12, 376  ;;  %v1453_v12 = vpack.c.bf16 %v1138_v0, %v1137_v63 }
 0x10f   :  { %v1021_v37 = vadd.f32 %v1311_v59, %v1020_v5  ;;  %v980_v61 = vadd.f32 %v1280_v57, %v979_v23  ;;  %v1459_v23 = vpack.c.bf16 %v1142_v21, %v1141_v20 }
 0x110   :  { %v530_v38 = vpop.permute.xlu1 %529  ;;  %v400_v62 = vpop.permute.xlu0 %399  ;;  %1454 = vmatpush3.bf16.msra.mxu0 %v1453_v12 }
 0x111   :  { %vm685_vm2 = vcmp.eq.s32.totalorder %v1658_v41, %v530_v38  ;;  %vm654_vm3 = vcmp.eq.s32.totalorder %v1658_v41, %v400_v62  ;;  %1455 = vmatprep.subr.bf16.mxu0 %v1499_v24 }
 0x112   :  { %v1373_v1 = vsel %vm685_vm2, 1.0, %v1498_v44  ;;  %v1342_v2 = vsel %vm654_vm3, 1.0, %v1498_v44  ;;  %561 = vbcast.lane.b32.xlu1 %v1577_v18, 368  ;;  %431 = vbcast.lane.b32.xlu0 %v1563_v14, 376  ;;  %v1456_v14 = vpack.c.bf16 %v1140_v6, %v1139_v11 }
 0x113   :  { %v1103_v3 = vadd.f32 %v1373_v1, %v1102_v32  ;;  %v1062_v4 = vadd.f32 %v1342_v2, %v1061_v33 }
 0x114   :  { %v337_v7 = vpop.permute.xlu1 %336  ;;  %v207_v9 = vpop.permute.xlu0 %206  ;;  %1457 = vmatpush3.bf16.msra.mxu0 %v1456_v14 }
 0x115   :  { %vm639_vm4 = vcmp.eq.s32.totalorder %v1658_v41, %v337_v7  ;;  %vm608_vm5 = vcmp.eq.s32.totalorder %v1658_v41, %v207_v9  ;;  %1458 = vmatprep.subr.bf16.mxu0 %v1499_v24 }
 0x116   :  { %v1327_v13 = vsel %vm639_vm4, 1.0, %v1498_v44  ;;  %v1296_v15 = vsel %vm608_vm5, 1.0, %v1498_v44  ;;  %565 = vbcast.lane.b32.xlu1 %v1577_v18, 376  ;;  %498 = vbcast.lane.b32.xlu0 %v1569_v16, 376 }
 0x117   :  { %v1042_v17 = vadd.f32 %v1327_v13, %v1041_v43  ;;  %v1001_v19 = vadd.f32 %v1296_v15, %v1000_v45 }
 0x118   :  { %v77_v22 = vpop.permute.xlu1 %76  ;;  %v467_v5 = vpop.permute.xlu0 %466  ;;  %1460 = vmatpush3.bf16.msra.mxu0 %v1459_v23 }
 0x119   :  { %vm577_vm7 = vcmp.eq.s32.totalorder %v1658_v41, %v77_v22  ;;  %vm670_vm8 = vcmp.eq.s32.totalorder %v1658_v41, %v467_v5 }
 0x11a   :  { %v1265_v16 = vsel %vm577_vm7, 1.0, %v1498_v44  ;;  %v1358_v18 = vsel %vm670_vm8, 1.0, %v1498_v44 }
 0x11b   :  { %v960_v25 = vadd.f32 %v1265_v16, %v959_v52  ;;  %v1083_v26 = vadd.f32 %v1358_v18, %v1082_v53 }
 0x11c   :  { %v274_v27 = vpop.permute.xlu1 %273  ;;  %v144_v28 = vpop.permute.xlu0 %143 }
 0x11d   :  { %vm624_vm9 = vcmp.eq.s32.totalorder %v1658_v41, %v274_v27  ;;  %vm593_vm10 = vcmp.eq.s32.totalorder %v1658_v41, %v144_v28 }
 0x11e   :  { %v1312_v29 = vsel %vm624_vm9, 1.0, %v1498_v44  ;;  %v1281_v30 = vsel %vm593_vm10, 1.0, %v1498_v44 }
 0x11f   :  { %v1022_v31 = vadd.f32 %v1312_v29, %v1021_v37  ;;  %v981_v32 = vadd.f32 %v1281_v30, %v980_v61 }
 0x120   :  { %v534_v24 = vpop.permute.xlu1 %533  ;;  %v404_v33 = vpop.permute.xlu0 %403 }
 0x121   :  { %vm686_vm11 = vcmp.eq.s32.totalorder %v1658_v41, %v534_v24  ;;  %vm655_vm12 = vcmp.eq.s32.totalorder %v1658_v41, %v404_v33 }
 0x122   :  { %v1374_v34 = vsel %vm686_vm11, 1.0, %v1498_v44  ;;  %v1343_v35 = vsel %vm655_vm12, 1.0, %v1498_v44 }
 0x123   :  { %v1104_v36 = vadd.f32 %v1374_v34, %v1103_v3  ;;  %v1063_v39 = vadd.f32 %v1343_v35, %v1062_v4 }
 0x124   :  { %v341_v40 = vpop.permute.xlu1 %340  ;;  %v211_v42 = vpop.permute.xlu0 %210 }
 0x125   :  { %vm640_vm13 = vcmp.eq.s32.totalorder %v1658_v41, %v341_v40  ;;  %vm609_vm14 = vcmp.eq.s32.totalorder %v1658_v41, %v211_v42 }
 0x126   :  { %v1328_v8 = vsel %vm640_vm13, 1.0, %v1498_v44  ;;  %v1297_v43 = vsel %vm609_vm14, 1.0, %v1498_v44 }
 0x127   :  { %v1043_v45 = vadd.f32 %v1328_v8, %v1042_v17  ;;  %v1002_v46 = vadd.f32 %v1297_v43, %v1001_v19 }
 0x128   :  { %v81_v48 = vpop.permute.xlu1 %80  ;;  %v471_v49 = vpop.permute.xlu0 %470 }
 0x129   :  { %vm578_vm15 = vcmp.eq.s32.totalorder %v1658_v41, %v81_v48  ;;  %vm671_vm0 = vcmp.eq.s32.totalorder %v1658_v41, %v471_v49 }
 0x12a   :  { %v1266_v47 = vsel %vm578_vm15, 1.0, %v1498_v44  ;;  %v1359_v50 = vsel %vm671_vm0, 1.0, %v1498_v44 }
 0x12b   :  { %v961_v10 = vadd.f32 %v1266_v47, %v960_v25  ;;  %v1084_v51 = vadd.f32 %v1359_v50, %v1083_v26 }
 0x12c   :  { %v278_v52 = vpop.permute.xlu1 %277  ;;  %v148_v53 = vpop.permute.xlu0 %147 }
 0x12d   :  { %vm625_vm1 = vcmp.eq.s32.totalorder %v1658_v41, %v278_v52  ;;  %vm594_vm2 = vcmp.eq.s32.totalorder %v1658_v41, %v148_v53 }
 0x12e   :  { %v1313_v54 = vsel %vm625_vm1, 1.0, %v1498_v44  ;;  %v1282_v55 = vsel %vm594_vm2, 1.0, %v1498_v44 }
 0x12f   :  { %v1023_v56 = vadd.f32 %v1313_v54, %v1022_v31  ;;  %v982_v58 = vadd.f32 %v1282_v55, %v981_v32 }
 0x130   :  { %v538_v59 = vpop.permute.xlu1 %537  ;;  %v408_v57 = vpop.permute.xlu0 %407 }
 0x131   :  { %vm687_vm3 = vcmp.eq.s32.totalorder %v1658_v41, %v538_v59  ;;  %vm656_vm4 = vcmp.eq.s32.totalorder %v1658_v41, %v408_v57 }
 0x132   :  { %v1375_v60 = vsel %vm687_vm3, 1.0, %v1498_v44  ;;  %v1344_v37 = vsel %vm656_vm4, 1.0, %v1498_v44 }
 0x133   :  { %v1105_v61 = vadd.f32 %v1375_v60, %v1104_v36  ;;  %v1064_v38 = vadd.f32 %v1344_v37, %v1063_v39 }
 0x134   :  { %v345_v62 = vpop.permute.xlu1 %344  ;;  %v215_v63 = vpop.permute.xlu0 %214 }
 0x135   :  { %vm641_vm5 = vcmp.eq.s32.totalorder %v1658_v41, %v345_v62  ;;  %vm610_vm6 = vcmp.eq.s32.totalorder %v1658_v41, %v215_v63 }
 0x136   :  { %v1329_v0 = vsel %vm641_vm5, 1.0, %v1498_v44  ;;  %v1298_v1 = vsel %vm610_vm6, 1.0, %v1498_v44 }
 0x137   :  { %v1044_v2 = vadd.f32 %v1329_v0, %v1043_v45  ;;  %v1003_v12 = vadd.f32 %v1298_v1, %v1002_v46 }
 0x138   :  { %v85_v3 = vpop.permute.xlu1 %84  ;;  %v475_v4 = vpop.permute.xlu0 %474 }
 0x139   :  { %vm579_vm7 = vcmp.eq.s32.totalorder %v1658_v41, %v85_v3  ;;  %vm672_vm8 = vcmp.eq.s32.totalorder %v1658_v41, %v475_v4 }
 0x13a   :  { %v1267_v7 = vsel %vm579_vm7, 1.0, %v1498_v44  ;;  %v1360_v9 = vsel %vm672_vm8, 1.0, %v1498_v44 }
 0x13b   :  { %v962_v11 = vadd.f32 %v1267_v7, %v961_v10  ;;  %v1085_v6 = vadd.f32 %v1360_v9, %v1084_v51 }
 0x13c   :  { %v282_v13 = vpop.permute.xlu1 %281  ;;  %v152_v15 = vpop.permute.xlu0 %151 }
 0x13d   :  { %vm626_vm9 = vcmp.eq.s32.totalorder %v1658_v41, %v282_v13  ;;  %vm595_vm10 = vcmp.eq.s32.totalorder %v1658_v41, %v152_v15 }
 0x13e   :  { %v1314_v14 = vsel %vm626_vm9, 1.0, %v1498_v44  ;;  %v1283_v17 = vsel %vm595_vm10, 1.0, %v1498_v44 }
 0x13f   :  { %v1024_v19 = vadd.f32 %v1314_v14, %v1023_v56  ;;  %v983_v20 = vadd.f32 %v1283_v17, %v982_v58 }
 0x140   :  { %v542_v21 = vpop.permute.xlu1 %541  ;;  %v412_v22 = vpop.permute.xlu0 %411 }
 0x141   :  { %vm688_vm11 = vcmp.eq.s32.totalorder %v1658_v41, %v542_v21  ;;  %vm657_vm12 = vcmp.eq.s32.totalorder %v1658_v41, %v412_v22 }
 0x142   :  { %v1376_v5 = vsel %vm688_vm11, 1.0, %v1498_v44  ;;  %v1345_v23 = vsel %vm657_vm12, 1.0, %v1498_v44 }
 0x143   :  { %v1106_v16 = vadd.f32 %v1376_v5, %v1105_v61  ;;  %v1065_v18 = vadd.f32 %v1345_v23, %v1064_v38 }
 0x144   :  { %v349_v25 = vpop.permute.xlu1 %348  ;;  %v219_v26 = vpop.permute.xlu0 %218 }
 0x145   :  { %vm642_vm13 = vcmp.eq.s32.totalorder %v1658_v41, %v349_v25  ;;  %vm611_vm14 = vcmp.eq.s32.totalorder %v1658_v41, %v219_v26 }
 0x146   :  { %v1330_v27 = vsel %vm642_vm13, 1.0, %v1498_v44  ;;  %v1299_v28 = vsel %vm611_vm14, 1.0, %v1498_v44 }
 0x147   :  { %v1045_v29 = vadd.f32 %v1330_v27, %v1044_v2  ;;  %v1004_v30 = vadd.f32 %v1299_v28, %v1003_v12 }
 0x148   :  { %v89_v31 = vpop.permute.xlu1 %88  ;;  %v479_v32 = vpop.permute.xlu0 %478 }
 0x149   :  { %vm580_vm15 = vcmp.eq.s32.totalorder %v1658_v41, %v89_v31  ;;  %vm673_vm0 = vcmp.eq.s32.totalorder %v1658_v41, %v479_v32 }
 0x14a   :  { %v1268_v24 = vsel %vm580_vm15, 1.0, %v1498_v44  ;;  %v1361_v33 = vsel %vm673_vm0, 1.0, %v1498_v44 }
 0x14b   :  { %v963_v34 = vadd.f32 %v1268_v24, %v962_v11  ;;  %v1086_v35 = vadd.f32 %v1361_v33, %v1085_v6 }
 0x14c   :  { %v286_v36 = vpop.permute.xlu1 %285  ;;  %v156_v39 = vpop.permute.xlu0 %155 }
 0x14d   :  { %vm627_vm1 = vcmp.eq.s32.totalorder %v1658_v41, %v286_v36  ;;  %vm596_vm2 = vcmp.eq.s32.totalorder %v1658_v41, %v156_v39 }
 0x14e   :  { %v1315_v40 = vsel %vm627_vm1, 1.0, %v1498_v44  ;;  %v1284_v42 = vsel %vm596_vm2, 1.0, %v1498_v44 }
 0x14f   :  { %v1025_v8 = vadd.f32 %v1315_v40, %v1024_v19  ;;  %v984_v43 = vadd.f32 %v1284_v42, %v983_v20 }
 0x150   :  { %v546_v45 = vpop.permute.xlu1 %545  ;;  %v416_v46 = vpop.permute.xlu0 %415 }
 0x151   :  { %vm689_vm3 = vcmp.eq.s32.totalorder %v1658_v41, %v546_v45  ;;  %vm658_vm4 = vcmp.eq.s32.totalorder %v1658_v41, %v416_v46 }
 0x152   :  { %v1377_v48 = vsel %vm689_vm3, 1.0, %v1498_v44  ;;  %v1346_v49 = vsel %vm658_vm4, 1.0, %v1498_v44 }
 0x153   :  { %v1107_v47 = vadd.f32 %v1377_v48, %v1106_v16  ;;  %v1066_v50 = vadd.f32 %v1346_v49, %v1065_v18 }
 0x154   :  { %v353_v10 = vpop.permute.xlu1 %352  ;;  %v223_v51 = vpop.permute.xlu0 %222 }
 0x155   :  { %vm643_vm5 = vcmp.eq.s32.totalorder %v1658_v41, %v353_v10  ;;  %vm612_vm6 = vcmp.eq.s32.totalorder %v1658_v41, %v223_v51 }
 0x156   :  { %v1331_v52 = vsel %vm643_vm5, 1.0, %v1498_v44  ;;  %v1300_v53 = vsel %vm612_vm6, 1.0, %v1498_v44 }
 0x157   :  { %v1046_v54 = vadd.f32 %v1331_v52, %v1045_v29  ;;  %v1005_v55 = vadd.f32 %v1300_v53, %v1004_v30 }
 0x158   :  { %v93_v56 = vpop.permute.xlu1 %92  ;;  %v483_v58 = vpop.permute.xlu0 %482 }
 0x159   :  { %vm581_vm7 = vcmp.eq.s32.totalorder %v1658_v41, %v93_v56  ;;  %vm674_vm8 = vcmp.eq.s32.totalorder %v1658_v41, %v483_v58 }
 0x15a   :  { %v1269_v59 = vsel %vm581_vm7, 1.0, %v1498_v44  ;;  %v1362_v57 = vsel %vm674_vm8, 1.0, %v1498_v44 }
 0x15b   :  { %v964_v60 = vadd.f32 %v1269_v59, %v963_v34  ;;  %v1087_v37 = vadd.f32 %v1362_v57, %v1086_v35 }
 0x15c   :  { %v290_v61 = vpop.permute.xlu1 %289  ;;  %v160_v38 = vpop.permute.xlu0 %159 }
 0x15d   :  { %vm628_vm9 = vcmp.eq.s32.totalorder %v1658_v41, %v290_v61  ;;  %vm597_vm10 = vcmp.eq.s32.totalorder %v1658_v41, %v160_v38 }
 0x15e   :  { %v1316_v62 = vsel %vm628_vm9, 1.0, %v1498_v44  ;;  %v1285_v63 = vsel %vm597_vm10, 1.0, %v1498_v44  ;;  %vm1158_vm9 = vcmask 1041409  }
 0x15f   :  { %v1026_v0 = vadd.f32 %v1316_v62, %v1025_v8  ;;  %v985_v1 = vadd.f32 %v1285_v63, %v984_v43 }
 0x160   :  { %v550_v2 = vpop.permute.xlu1 %549  ;;  %v420_v12 = vpop.permute.xlu0 %419 }
 0x161   :  { %vm690_vm11 = vcmp.eq.s32.totalorder %v1658_v41, %v550_v2  ;;  %vm659_vm12 = vcmp.eq.s32.totalorder %v1658_v41, %v420_v12 }
 0x162   :  { %v1378_v3 = vsel %vm690_vm11, 1.0, %v1498_v44  ;;  %v1347_v4 = vsel %vm659_vm12, 1.0, %v1498_v44 }
 0x163   :  { %v1108_v7 = vadd.f32 %v1378_v3, %v1107_v47  ;;  %v1067_v9 = vadd.f32 %v1347_v4, %v1066_v50 }
 0x164   :  { %v357_v11 = vpop.permute.xlu1 %356  ;;  %v227_v6 = vpop.permute.xlu0 %226 }
 0x165   :  { %vm644_vm13 = vcmp.eq.s32.totalorder %v1658_v41, %v357_v11  ;;  %vm613_vm14 = vcmp.eq.s32.totalorder %v1658_v41, %v227_v6 }
 0x166   :  { %v1332_v13 = vsel %vm644_vm13, 1.0, %v1498_v44  ;;  %v1301_v15 = vsel %vm613_vm14, 1.0, %v1498_v44  ;;  %vm1160_vm14 = vcmask 1042434  }
 0x167   :  { %v1047_v14 = vadd.f32 %v1332_v13, %v1046_v54  ;;  %v1006_v17 = vadd.f32 %v1301_v15, %v1005_v55 }
 0x168   :  { %v97_v19 = vpop.permute.xlu1 %96  ;;  %v487_v20 = vpop.permute.xlu0 %486 }
 0x169   :  { %vm582_vm15 = vcmp.eq.s32.totalorder %v1658_v41, %v97_v19  ;;  %vm675_vm0 = vcmp.eq.s32.totalorder %v1658_v41, %v487_v20 }
 0x16a   :  { %v1270_v21 = vsel %vm582_vm15, 1.0, %v1498_v44  ;;  %v1363_v22 = vsel %vm675_vm0, 1.0, %v1498_v44 }
 0x16b   :  { %v965_v5 = vadd.f32 %v1270_v21, %v964_v60  ;;  %v1088_v23 = vadd.f32 %v1363_v22, %v1087_v37 }
 0x16c   :  { %v294_v16 = vpop.permute.xlu1 %293  ;;  %v164_v18 = vpop.permute.xlu0 %163 }
 0x16d   :  { %v966_v25 = vrot.slane %v965_v5, 4  ;;  %vm629_vm1 = vcmp.eq.s32.totalorder %v1658_v41, %v294_v16  ;;  %vm598_vm2 = vcmp.eq.s32.totalorder %v1658_v41, %v164_v18 }
 0x16e   :  { %v1317_v26 = vsel %vm629_vm1, 1.0, %v1498_v44  ;;  %v1286_v27 = vsel %vm598_vm2, 1.0, %v1498_v44  ;;  %vm1162_vm1 = vcmask 1043459  }
 0x16f   :  { %v967_v28 = vadd.f32 %v966_v25, %v965_v5  ;;  %v1027_v29 = vadd.f32 %v1317_v26, %v1026_v0  ;;  %v986_v30 = vadd.f32 %v1286_v27, %v985_v1 }
 0x170   :  { %v554_v31 = vpop.permute.xlu1 %553  ;;  %v424_v32 = vpop.permute.xlu0 %423 }
 0x171   :  { %v968_v24 = vrot.slane %v967_v28, 2  ;;  %v987_v33 = vrot.slane %v986_v30, 4  ;;  %vm691_vm3 = vcmp.eq.s32.totalorder %v1658_v41, %v554_v31  ;;  %vm660_vm4 = vcmp.eq.s32.totalorder %v1658_v41, %v424_v32 }
 0x172   :  { %v1379_v34 = vsel %vm691_vm3, 1.0, %v1498_v44  ;;  %v1348_v35 = vsel %vm660_vm4, 1.0, %v1498_v44  ;;  %vm1164_vm4 = vcmask 1044484  }
 0x173   :  { %v969_v36 = vadd.f32 %v968_v24, %v967_v28  ;;  %v988_v39 = vadd.f32 %v987_v33, %v986_v30  ;;  %v1109_v40 = vadd.f32 %v1379_v34, %v1108_v7  ;;  %v1068_v42 = vadd.f32 %v1348_v35, %v1067_v9 }
 0x174   :  { %v361_v8 = vpop.permute.xlu1 %360  ;;  %v231_v43 = vpop.permute.xlu0 %230 }
 0x175   :  { %v970_v45 = vrot.slane %v969_v36, 1  ;;  %v989_v46 = vrot.slane %v988_v39, 2  ;;  %vm645_vm5 = vcmp.eq.s32.totalorder %v1658_v41, %v361_v8  ;;  %vm614_vm6 = vcmp.eq.s32.totalorder %v1658_v41, %v231_v43 }
 0x176   :  { %v1333_v48 = vsel %vm645_vm5, 1.0, %v1498_v44  ;;  %v1302_v49 = vsel %vm614_vm6, 1.0, %v1498_v44  ;;  %vm1166_vm5 = vcmask 1045509   ;;  %vm1168_vm6 = vcmask 1046534  }
 0x177   :  { %v990_v47 = vadd.f32 %v989_v46, %v988_v39  ;;  %v1048_v50 = vadd.f32 %v1333_v48, %v1047_v14  ;;  %v1007_v10 = vadd.f32 %v1302_v49, %v1006_v17  ;;  %v971_v51 = vadd.f32 %v970_v45, %v969_v36 }
 0x178   :  { %v298_v52 = vpop.permute.xlu1 %297  ;;  %v491_v53 = vpop.permute.xlu0 %490 }
 0x179   :  { %v991_v54 = vrot.slane %v990_v47, 1  ;;  %v1008_v55 = vrot.slane %v1007_v10, 4  ;;  %vm630_vm7 = vcmp.eq.s32.totalorder %v1658_v41, %v298_v52  ;;  %vm676_vm8 = vcmp.eq.s32.totalorder %v1658_v41, %v491_v53 }
 0x17a   :  { %v1318_v56 = vsel %vm630_vm7, 1.0, %v1498_v44  ;;  %v1364_v60 = vsel %vm676_vm8, 1.0, %v1498_v44  ;;  %v1119_v37 = vmul.f32 0.125, %v971_v51  ;;  %vm1170_vm7 = vcmask 1047559  }
 0x17b   :  { %v992_v58 = vadd.f32 %v991_v54, %v990_v47  ;;  %v1009_v59 = vadd.f32 %v1008_v55, %v1007_v10  ;;  %v1028_v57 = vadd.f32 %v1318_v56, %v1027_v29  ;;  %v1089_v61 = vadd.f32 %v1364_v60, %v1088_v23 }
 0x17c   :  { %v558_v38 = vpop.permute.xlu1 %557  ;;  %v428_v62 = vpop.permute.xlu0 %427 }
 0x17d   :  { %v1120_v63 = vmul.f32 0.125, %v992_v58  ;;  %v1010_v0 = vrot.slane %v1009_v59, 2  ;;  %v1029_v1 = vrot.slane %v1028_v57, 4  ;;  %vm692_vm10 = vcmp.eq.s32.totalorder %v1658_v41, %v558_v38 }
 0x17e   :  { %v1380_v2 = vsel %vm692_vm10, 1.0, %v1498_v44  ;;  %vm661_vm11 = vcmp.eq.s32.totalorder %v1658_v41, %v428_v62 }
 0x17f   :  { %v1159_v12 = vsel %vm1158_vm9, %v1120_v63, %v1119_v37  ;;  %v1011_v3 = vadd.f32 %v1010_v0, %v1009_v59  ;;  %v1030_v4 = vadd.f32 %v1029_v1, %v1028_v57  ;;  %v1110_v7 = vadd.f32 %v1380_v2, %v1109_v40 }
 0x180   :  { %v1349_v9 = vsel %vm661_vm11, 1.0, %v1498_v44  ;;  %v495_v11 = vpop.permute.xlu1 %494  ;;  %v365_v6 = vpop.permute.xlu0 %364 }
 0x181   :  { %v1012_v13 = vrot.slane %v1011_v3, 1  ;;  %v1031_v15 = vrot.slane %v1030_v4, 2  ;;  %v1069_v14 = vadd.f32 %v1349_v9, %v1068_v42  ;;  %vm677_vm12 = vcmp.eq.s32.totalorder %v1658_v41, %v495_v11 }
 0x182   :  { %v1365_v17 = vsel %vm677_vm12, 1.0, %v1498_v44  ;;  %vm646_vm13 = vcmp.eq.s32.totalorder %v1658_v41, %v365_v6 }
 0x183   :  { %v1013_v19 = vadd.f32 %v1012_v13, %v1011_v3  ;;  %v1032_v20 = vadd.f32 %v1031_v15, %v1030_v4  ;;  %v1090_v21 = vadd.f32 %v1365_v17, %v1089_v61  ;;  %v1334_v22 = vsel %vm646_vm13, 1.0, %v1498_v44  ;;  %v1383_v4 = vld [vmem:[%s2033_s2] ss:$0 sm:$0xff] }
 0x184   :  { %v1049_v5 = vadd.f32 %v1334_v22, %v1048_v50  ;;  %v562_v23 = vpop.permute.xlu1 %561  ;;  %v432_v16 = vpop.permute.xlu0 %431 }
 0x185   :  { %v1121_v18 = vmul.f32 0.125, %v1013_v19  ;;  %v1033_v25 = vrot.slane %v1032_v20, 1  ;;  %vm693_vm15 = vcmp.eq.s32.totalorder %v1658_v41, %v562_v23  ;;  %vm662_vm0 = vcmp.eq.s32.totalorder %v1658_v41, %v432_v16 }
 0x186   :  { %v1050_v26 = vrot.slane %v1049_v5, 4  ;;  %v1381_v27 = vsel %vm693_vm15, 1.0, %v1498_v44  ;;  %v1350_v28 = vsel %vm662_vm0, 1.0, %v1498_v44 }
 0x187   :  { %v1034_v29 = vadd.f32 %v1033_v25, %v1032_v20  ;;  %v1111_v30 = vadd.f32 %v1381_v27, %v1110_v7  ;;  %v1070_v31 = vadd.f32 %v1350_v28, %v1069_v14  ;;  %v1161_v32 = vsel %vm1160_vm14, %v1121_v18, %v1159_v12 }
 0x188   :  { %v1051_v24 = vadd.f32 %v1050_v26, %v1049_v5  ;;  %v566_v33 = vpop.permute.xlu1 %565  ;;  %v499_v34 = vpop.permute.xlu0 %498 }
 0x189   :  { %v1122_v35 = vmul.f32 0.125, %v1034_v29  ;;  %v1071_v36 = vrot.slane %v1070_v31, 4  ;;  %vm694_vm2 = vcmp.eq.s32.totalorder %v1658_v41, %v566_v33  ;;  %vm678_vm3 = vcmp.eq.s32.totalorder %v1658_v41, %v499_v34 }
 0x18a   :  { %v1052_v39 = vrot.slane %v1051_v24, 2  ;;  %v1382_v40 = vsel %vm694_vm2, 1.0, %v1498_v44  ;;  %v1366_v42 = vsel %vm678_vm3, 1.0, %v1498_v44 }
 0x18b   :  { %v1072_v8 = vadd.f32 %v1071_v36, %v1070_v31  ;;  %v1112_v43 = vadd.f32 %v1382_v40, %v1111_v30  ;;  %v1091_v45 = vadd.f32 %v1366_v42, %v1090_v21  ;;  %v1163_v46 = vsel %vm1162_vm1, %v1122_v35, %v1161_v32 }
 0x18c   :  { %v1053_v48 = vadd.f32 %v1052_v39, %v1051_v24 }
 0x18d   :  { %v1073_v49 = vrot.slane %v1072_v8, 2  ;;  %v1113_v47 = vrot.slane %v1112_v43, 4  ;;  %v1092_v50 = vrot.slane %v1091_v45, 4 }
 0x18e   :  { %v1054_v10 = vrot.slane %v1053_v48, 1 }
 0x18f   :  { %v1074_v51 = vadd.f32 %v1073_v49, %v1072_v8  ;;  %v1114_v52 = vadd.f32 %v1113_v47, %v1112_v43  ;;  %v1093_v53 = vadd.f32 %v1092_v50, %v1091_v45 }
 0x190   :  { %v1055_v54 = vadd.f32 %v1054_v10, %v1053_v48 }
 0x191   :  { %v1075_v55 = vrot.slane %v1074_v51, 1  ;;  %v1115_v41 = vrot.slane %v1114_v52, 2  ;;  %v1094_v56 = vrot.slane %v1093_v53, 2 }
 0x192   :  { %v1123_v58 = vmul.f32 0.125, %v1055_v54 }
 0x193   :  { %v1076_v59 = vadd.f32 %v1075_v55, %v1074_v51  ;;  %v1116_v44 = vadd.f32 %v1115_v41, %v1114_v52  ;;  %v1095_v57 = vadd.f32 %v1094_v56, %v1093_v53 }
 0x194   :  { %v1165_v60 = vsel %vm1164_vm4, %v1123_v58, %v1163_v46 }
 0x195   :  { %v1124_v37 = vmul.f32 0.125, %v1076_v59  ;;  %v1117_v61 = vrot.slane %v1116_v44, 1  ;;  %v1096_v38 = vrot.slane %v1095_v57, 1 }
 0x197   :  { %v1097_v62 = vadd.f32 %v1096_v38, %v1095_v57  ;;  %v1118_v63 = vadd.f32 %v1117_v61, %v1116_v44  ;;  %v1167_v0 = vsel %vm1166_vm5, %v1124_v37, %v1165_v60 }
 0x199   :  { %v1125_v1 = vmul.f32 0.125, %v1097_v62  ;;  %v1126_v2 = vmul.f32 0.125, %v1118_v63 }
 0x19b   :  { %v1169_v12 = vsel %vm1168_vm6, %v1125_v1, %v1167_v0 }
 0x19c   :  { %v1171_v3 = vsel %vm1170_vm7, %v1126_v2, %v1169_v12 }
 0x19d   :  { %1435 = vmatmul.mubr.f32.vlgmr.msra.gmra.mrb[0].mxu0 %v1171_v3 }
 0x270   :  { %v1239_v7 = vpop.f32.mrb[0].mxu0 }
 0x271   :  { %v1240_v9 = vadd.f32 %v1383_v4, %v1239_v7  ;;  %v1436_v11 = vpop.f32.mrb[1].mxu0 }
 0x273   :  { %v1384_v6 = vmul.f32 -1.442695, %v1240_v9 }
 0x275   :  { %1467 = vpow2.f32 %v1384_v6 }
 0x27f   :  { %v1468_v13 = vpop.eup %1467 }
 0x280   :  { %v1246_v15 = vadd.f32 1.0, %v1468_v13 }
 0x282   :  { %1469 = vrcp.f32 %v1246_v15 }
 0x28c   :  { %v1470_v14 = vpop.eup %1469 }
 0x28d   :  { %1249 = vst [vmem:[%s2034_s3] sm:$0xff] %v1470_v14 }
 0x28e   :  { %1254 = vsyncpa [#allocation3], 1 }

</bundles_post_ra>
